<compile_context>
chip_gen: v7x
topology: tpu7x:2x2x1
jax: 0.10.0
libtpu: 0.0.40
codegen_flags: <defaults>
</compile_context>

<pallas_src>
import jax
import jax.numpy as jnp
from jax.experimental import pallas as pl
from jax.experimental.pallas import tpu as pltpu

STATE_DIM = 3          # Pendulum-v1 observation dim
HIDDEN_DIM = 128
ACTION_DIM = 11
ACTION_SUB = 16        # fc2 out-dim padded to a sublane multiple (MXU M dim)

LANE = 128             # batch sits on lanes -> tiles are 128-row aligned
MAX_TB = 4096          # max batch rows per grid step (review: 2048-4096)


def qnet_kernel(xt_ref, w1_ref, b1_ref, w2_ref, b2_ref, o_ref):
    # Batch-on-lanes: every tensor here carries the batch on the lane (last)
    # axis, so the input DMA, VMEM tiles and the output writeback are all
    # lane-dense with zero column padding.
    xt = xt_ref[...]                                   # [STATE_DIM, TB]
    w1 = w1_ref[...]                                   # [HIDDEN_DIM, STATE_DIM]

    # fc1: K = 3 is far too shallow for the MXU -> 3 VPU broadcast-FMAs
    # (statically unrolled). The x-row factor is a stride-0 sublane broadcast;
    # the weight-column factor is a small lane broadcast (XLU slot, idle).
    acc = w1[:, 0:1] * xt[0:1, :]
    for k in range(1, STATE_DIM):
        acc = acc + w1[:, k:k + 1] * xt[k:k + 1, :]
    ht = jnp.maximum(acc + b1_ref[...], 0.0)           # [HIDDEN_DIM, TB], ReLU

    # fc2 on the MXU: [ACTION_SUB, H] @ [H, TB] with f32 accumulation. The
    # weight's out dim was zero-padded 11 -> 16 once at prepare_params time so
    # M is sublane-aligned; only the 11 real rows are written back (44 B/row).
    qt = jnp.dot(w2_ref[...], ht, preferred_element_type=jnp.float32)
    o_ref[...] = (qt[:ACTION_DIM, :] + b2_ref[...]).astype(o_ref.dtype)


def _round_up(n, m):
    return ((n + m - 1) // m) * m


def _cdiv(a, b):
    return -(-a // b)


def _choose_tiling(batch):
    """Pick (tile_rows, padded_batch, num_tiles) with bounded padding waste."""
    tiles = max(1, _cdiv(batch, MAX_TB))
    # v7x has 2 TensorCores: give both work once the batch is big enough.
    if batch >= 1024 and tiles < 2:
        tiles = 2
    if tiles > 1 and tiles % 2:
        tiles += 1                      # even grid splits cleanly on 2 TCs
    tb = _round_up(_cdiv(batch, tiles), LANE)   # lane-aligned rows per tile
    return tb, tb * tiles, tiles


def prepare_params(w1, b1, w2, b2):
    """One-time (hoisted) transform from torch layout to kernel layout.

    torch layout: w1 [H, S], b1 [H], w2 [A, H], b2 [A].
    kernel layout: biases as column vectors; fc2 weight rows zero-padded
    ACTION_DIM -> ACTION_SUB so the MXU M dim is sublane-aligned.
    """
    w2_p = jnp.pad(w2, ((0, ACTION_SUB - ACTION_DIM), (0, 0)))
    return w1, b1.reshape(HIDDEN_DIM, 1), w2_p, b2.reshape(ACTION_DIM, 1)


def qnet_forward(x, w1, b1, w2p, b2):
    """x: [B, STATE_DIM] f32 -> q: [B, ACTION_DIM] f32 (kernel-layout params)."""
    B = x.shape[0]
    tb, b_pad, tiles = _choose_tiling(B)

    # Tiny layout ops on the 12 B/row input; skipped pad when already aligned.
    xt = x.T                                            # [STATE_DIM, B]
    if b_pad != B:
        xt = jnp.pad(xt, ((0, 0), (0, b_pad - B)))

    pinned = lambda shape: pl.BlockSpec(shape, lambda i: (0, 0))

    qt = pl.pallas_call(
        qnet_kernel,
        out_shape=jax.ShapeDtypeStruct((ACTION_DIM, b_pad), jnp.float32),
        grid=(tiles,),
        in_specs=[
            pl.BlockSpec((STATE_DIM, tb), lambda i: (0, i)),   # x^T, streamed
            pinned((HIDDEN_DIM, STATE_DIM)),                   # fc1.weight (VMEM-resident)
            pinned((HIDDEN_DIM, 1)),                           # fc1.bias (column)
            pinned((ACTION_SUB, HIDDEN_DIM)),                  # fc2.weight (row-padded)
            pinned((ACTION_DIM, 1)),                           # fc2.bias (column)
        ],
        out_specs=pl.BlockSpec((ACTION_DIM, tb), lambda i: (0, i)),
        compiler_params=pltpu.CompilerParams(
            dimension_semantics=("parallel",),      # 2 TCs split batch on v7x
            vmem_limit_bytes=32 * 1024 * 1024,      # v5e default is 16 MiB
        ),
    )(xt, w1, b1, w2p, b2)

    # TODO(synk): the downstream double-DQN update (target-net forward,
    # argmax/gather, TD target) could consume q^T directly and be fused into
    # this pallas_call, removing this final transpose entirely; out of scope
    # for the plain Qnet.forward spec.
    if b_pad != B:
        qt = qt[:, :B]
    return qt.T


def init_params(key):
    """Torch-layout params, PyTorch Linear default init U[-1/sqrt(in), 1/sqrt(in)]."""
    k1, k2, k3, k4 = jax.random.split(key, 4)
    bound1 = 1.0 / jnp.sqrt(jnp.float32(STATE_DIM))
    bound2 = 1.0 / jnp.sqrt(jnp.float32(HIDDEN_DIM))
    w1 = jax.random.uniform(k1, (HIDDEN_DIM, STATE_DIM), jnp.float32, -bound1, bound1)
    b1 = jax.random.uniform(k2, (HIDDEN_DIM,), jnp.float32, -bound1, bound1)
    w2 = jax.random.uniform(k3, (ACTION_DIM, HIDDEN_DIM), jnp.float32, -bound2, bound2)
    b2 = jax.random.uniform(k4, (ACTION_DIM,), jnp.float32, -bound2, bound2)
    return w1, b1, w2, b2


def qnet_reference(x, w1, b1, w2, b2):
    h = jnp.maximum(x @ w1.T + b1, 0.0)
    return h @ w2.T + b2


if __name__ == "__main__":
    key = jax.random.PRNGKey(0)
    k_param, k_x = jax.random.split(key)
    torch_params = init_params(k_param)               # torch layout
    kernel_params = prepare_params(*torch_params)     # one-time, hoisted

    fwd = jax.jit(qnet_forward)

    # Small smoke test: B=8 (single 128-wide lane tile, grid=1).
    B = 8
    x = jax.random.normal(k_x, (B, STATE_DIM), jnp.float32)
    q = jax.block_until_ready(fwd(x, *kernel_params))
    q_ref = qnet_reference(x, *torch_params)
    assert q.shape == (B, ACTION_DIM)
    assert jnp.allclose(q, q_ref, atol=1e-5, rtol=1e-5), "mismatch vs reference (B=8)"

    # Padded-batch / multi-tile path: grid=2, exercises the "parallel" split.
    B2 = 1300
    x2 = jax.random.normal(jax.random.PRNGKey(1), (B2, STATE_DIM), jnp.float32)
    q2 = jax.block_until_ready(fwd(x2, *kernel_params))
    q2_ref = qnet_reference(x2, *torch_params)
    assert q2.shape == (B2, ACTION_DIM)
    assert jnp.allclose(q2, q2_ref, atol=1e-5, rtol=1e-5), "mismatch vs reference (B=1300)"

    print("KERNEL_OK")
</pallas_src>

<mosaic_0001>
module attributes {stable_mosaic.version = 11 : i64} {
  func.func @qnet_kernel(%arg0: i32, %arg1: memref<3x128xf32, #tpu.memory_space<vmem>>, %arg2: memref<128x3xf32, #tpu.memory_space<vmem>>, %arg3: memref<128x1xf32, #tpu.memory_space<vmem>>, %arg4: memref<16x128xf32, #tpu.memory_space<vmem>>, %arg5: memref<11x1xf32, #tpu.memory_space<vmem>>, %arg6: memref<11x128xf32, #tpu.memory_space<vmem>>) attributes {dimension_semantics = [#tpu.dimension_semantics<parallel>], iteration_bounds = array<i64: 1>, scalar_prefetch = 0 : i64, scratch_operands = 0 : i64, tpu.core_type = #tpu.core_type<tc>, window_params = [{transform_indices = @transform_0, window_bounds = array<i64: 3, 128>}, {pipeline_mode = #tpu.pipeline_mode<synchronous>, transform_indices = @transform_1, window_bounds = array<i64: 128, 3>}, {pipeline_mode = #tpu.pipeline_mode<synchronous>, transform_indices = @transform_2, window_bounds = array<i64: 128, 1>}, {pipeline_mode = #tpu.pipeline_mode<synchronous>, transform_indices = @transform_3, window_bounds = array<i64: 16, 128>}, {pipeline_mode = #tpu.pipeline_mode<synchronous>, transform_indices = @transform_4, window_bounds = array<i64: 11, 1>}, {transform_indices = @transform_5, window_bounds = array<i64: 11, 128>}]} {
    %c0 = arith.constant 0 : index
    %c0_0 = arith.constant 0 : index
    %0 = vector.load %arg1[%c0, %c0_0] : memref<3x128xf32, #tpu.memory_space<vmem>>, vector<3x128xf32>
    %c0_1 = arith.constant 0 : index
    %c0_2 = arith.constant 0 : index
    %1 = vector.load %arg2[%c0_1, %c0_2] : memref<128x3xf32, #tpu.memory_space<vmem>>, vector<128x3xf32>
    %2 = vector.extract_strided_slice %1 {offsets = [0, 0], sizes = [128, 1], strides = [1, 1]} : vector<128x3xf32> to vector<128x1xf32>
    %3 = vector.extract_strided_slice %0 {offsets = [0, 0], sizes = [1, 128], strides = [1, 1]} : vector<3x128xf32> to vector<1x128xf32>
    %4 = vector.broadcast %2 : vector<128x1xf32> to vector<128x128xf32>
    %5 = vector.broadcast %3 : vector<1x128xf32> to vector<128x128xf32>
    %6 = arith.mulf %4, %5 : vector<128x128xf32>
    %7 = vector.extract_strided_slice %1 {offsets = [0, 1], sizes = [128, 1], strides = [1, 1]} : vector<128x3xf32> to vector<128x1xf32>
    %8 = vector.extract_strided_slice %0 {offsets = [1, 0], sizes = [1, 128], strides = [1, 1]} : vector<3x128xf32> to vector<1x128xf32>
    %9 = vector.broadcast %7 : vector<128x1xf32> to vector<128x128xf32>
    %10 = vector.broadcast %8 : vector<1x128xf32> to vector<128x128xf32>
    %11 = arith.mulf %9, %10 : vector<128x128xf32>
    %12 = arith.addf %6, %11 : vector<128x128xf32>
    %13 = vector.extract_strided_slice %1 {offsets = [0, 2], sizes = [128, 1], strides = [1, 1]} : vector<128x3xf32> to vector<128x1xf32>
    %14 = vector.extract_strided_slice %0 {offsets = [2, 0], sizes = [1, 128], strides = [1, 1]} : vector<3x128xf32> to vector<1x128xf32>
    %15 = vector.broadcast %13 : vector<128x1xf32> to vector<128x128xf32>
    %16 = vector.broadcast %14 : vector<1x128xf32> to vector<128x128xf32>
    %17 = arith.mulf %15, %16 : vector<128x128xf32>
    %18 = arith.addf %12, %17 : vector<128x128xf32>
    %c0_3 = arith.constant 0 : index
    %c0_4 = arith.constant 0 : index
    %19 = vector.load %arg3[%c0_3, %c0_4] : memref<128x1xf32, #tpu.memory_space<vmem>>, vector<128x1xf32>
    %20 = vector.broadcast %19 : vector<128x1xf32> to vector<128x128xf32>
    %21 = arith.addf %18, %20 : vector<128x128xf32>
    %cst = arith.constant 0.000000e+00 : f32
    %22 = vector.broadcast %cst : f32 to vector<128x128xf32>
    %23 = arith.maximumf %21, %22 : vector<128x128xf32>
    %c0_5 = arith.constant 0 : index
    %c0_6 = arith.constant 0 : index
    %24 = vector.load %arg4[%c0_5, %c0_6] : memref<16x128xf32, #tpu.memory_space<vmem>>, vector<16x128xf32>
    %cst_7 = arith.constant dense<0.000000e+00> : vector<16x128xf32>
    %25 = tpu.matmul %24, %23, %cst_7 {dimension_numbers = #tpu.dot_dimension_numbers<[1], [0], [0], [1], [0, 0, 1, 1], [], []>} : vector<16x128xf32>, vector<128x128xf32>, vector<16x128xf32> -> vector<16x128xf32>
    %26 = vector.extract_strided_slice %25 {offsets = [0, 0], sizes = [11, 128], strides = [1, 1]} : vector<16x128xf32> to vector<11x128xf32>
    %c0_8 = arith.constant 0 : index
    %c0_9 = arith.constant 0 : index
    %27 = vector.load %arg5[%c0_8, %c0_9] : memref<11x1xf32, #tpu.memory_space<vmem>>, vector<11x1xf32>
    %28 = vector.broadcast %27 : vector<11x1xf32> to vector<11x128xf32>
    %29 = arith.addf %26, %28 : vector<11x128xf32>
    %c0_10 = arith.constant 0 : index
    %c0_11 = arith.constant 0 : index
    %30 = vector.load %arg6[%c0_10, %c0_11] : memref<11x128xf32, #tpu.memory_space<vmem>>, vector<11x128xf32>
    tpu.vector_store %arg6[%c0_10, %c0_11], %29 {strides = array<i32>} : memref<11x128xf32, #tpu.memory_space<vmem>>, vector<11x128xf32>,
    return
  }
  func.func @transform_0(%arg0: i32) -> (i32, i32) {
    %c0_i32 = arith.constant 0 : i32
    %c0_i32_0 = arith.constant 0 : i32
    return %c0_i32, %arg0 : i32, i32
  }
  func.func @transform_1(%arg0: i32) -> (i32, i32) {
    %c0_i32 = arith.constant 0 : i32
    %c0_i32_0 = arith.constant 0 : i32
    %c0_i32_1 = arith.constant 0 : i32
    return %c0_i32, %c0_i32_0 : i32, i32
  }
  func.func @transform_2(%arg0: i32) -> (i32, i32) {
    %c0_i32 = arith.constant 0 : i32
    %c0_i32_0 = arith.constant 0 : i32
    %c0_i32_1 = arith.constant 0 : i32
    return %c0_i32, %c0_i32_0 : i32, i32
  }
  func.func @transform_3(%arg0: i32) -> (i32, i32) {
    %c0_i32 = arith.constant 0 : i32
    %c0_i32_0 = arith.constant 0 : i32
    %c0_i32_1 = arith.constant 0 : i32
    return %c0_i32, %c0_i32_0 : i32, i32
  }
  func.func @transform_4(%arg0: i32) -> (i32, i32) {
    %c0_i32 = arith.constant 0 : i32
    %c0_i32_0 = arith.constant 0 : i32
    %c0_i32_1 = arith.constant 0 : i32
    return %c0_i32, %c0_i32_0 : i32, i32
  }
  func.func @transform_5(%arg0: i32) -> (i32, i32) {
    %c0_i32 = arith.constant 0 : i32
    %c0_i32_0 = arith.constant 0 : i32
    return %c0_i32, %arg0 : i32, i32
  }
}

</mosaic_0001>

<bundles_post_ra>
// kernel: qnet_forward.1
= control target key start
LH: loop header
LB: loop body
LE: loop exit
PB: predicated region body
PF: predicated region fallthrough
CT: control target
= control target key end

     0   :  { %v677_v0 = vmov 2   ;;  %v678_v1 = vmov 1   ;;  %v679_v7 = vmov 0   ;;  %v117_v44 = vlaneseq  ;;  %s952_s1 = inlined_call_operand.vmem [shape: f32[128,3], index: 1, kind: input, shape index: {}]   ;;  %s953_s2 = inlined_call_operand.vmem [shape: f32[128,1], index: 2, kind: input, shape index: {}]   ;;  %s954_s4 = inlined_call_operand.vmem [shape: f32[11,1], index: 4, kind: input, shape index: {}]   ;;  %s955_s0 = inlined_call_operand.vmem [shape: f32[3,128], index: 0, kind: input, shape index: {}]   ;;  %s956_s3 = inlined_call_operand.vmem [shape: f32[16,128], index: 3, kind: input, shape index: {}]   ;;  %s957_s5 = inlined_call_operand.vmem [shape: f32[11,128], index: 5, kind: output, shape index: {}]  }
   0x1   :  { %651 = vset.pattern.permute.xlu0 %v677_v0  ;;  %650 = vset.pattern.permute.xlu1 %v678_v1  ;;  %v21_v2 = vld [vmem:[%s952_s1] sm:$0xff]  ;;  %v23_v3 = vld [vmem:[%s952_s1 + $0x10] sm:$0xff]  ;;  %v22_v4 = vld [vmem:[%s952_s1 + $0x8] sm:$0xff] }
   0x2   :  { %238 = vperm.xlu0 %651, %v21_v2   ;;  %138 = vperm.xlu1 %650, %v21_v2   ;;  %v26_v5 = vld [vmem:[%s952_s1 + $0x28] sm:$0xff]  ;;  %v25_v6 = vld [vmem:[%s952_s1 + $0x20] sm:$0xff]  ;;  %v28_v8 = vld [vmem:[%s952_s1 + $0x38] sm:$0xff]  ;;  %v118_v48 = vshrl.u32 %v117_v44, 7 }
   0x3   :  { %v737_v9 = vld [vmem:[%s952_s1 + $0x48] sm:$0xff]  ;;  %v24_v10 = vld [vmem:[%s952_s1 + $0x18] sm:$0xff]  ;;  %v337_v14 = vld [vmem:[%s953_s2] sm:$0xff] }
   0x4   :  { %v746_v11 = vld [vmem:[%s952_s1 + $0x58] sm:$0xff]  ;;  %v752_v12 = vld [vmem:[%s952_s1 + $0x68] sm:$0xff]  ;;  %v27_v16 = vld [vmem:[%s952_s1 + $0x30] sm:$0xff]  ;;  %v203_v51 = vsub.s32 1, %v118_v48  ;;  %v119_v53 = vsub.s32 0, %v118_v48  ;;  %v303_v57 = vsub.s32 2, %v118_v48 }
   0x5   :  { %v759_v13 = vld [vmem:[%s952_s1 + $0x78] sm:$0xff]  ;;  %v338_v15 = vld [vmem:[%s953_s2 + $0x8] sm:$0xff]  ;;  %v339_v17 = vld [vmem:[%s953_s2 + $0x10] sm:$0xff] }
   0x6   :  { %246 = vperm.xlu0 %651, %v23_v3   ;;  %142 = vperm.xlu1 %650, %v22_v4   ;;  %v341_v18 = vld [vmem:[%s953_s2 + $0x20] sm:$0xff]  ;;  %v340_v19 = vld [vmem:[%s953_s2 + $0x18] sm:$0xff]  ;;  %v343_v20 = vld [vmem:[%s953_s2 + $0x30] sm:$0xff] }
   0x7   :  { %v345_v21 = vld [vmem:[%s953_s2 + $0x40] sm:$0xff]  ;;  %v347_v22 = vld [vmem:[%s953_s2 + $0x50] sm:$0xff]  ;;  %v342_v23 = vld [vmem:[%s953_s2 + $0x28] sm:$0xff] }
   0x8   :  { %v29_v24 = vld [vmem:[%s952_s1 + $0x40] sm:$0xff]  ;;  %v352_v26 = vld [vmem:[%s953_s2 + $0x78] sm:$0xff]  ;;  %v543_v27 = vld [vmem:[%s954_s4 + $0x8] sm:$0x7] }
   0x9   :  { %v349_v25 = vld [vmem:[%s953_s2 + $0x60] sm:$0xff]  ;;  %v344_v28 = vld [vmem:[%s953_s2 + $0x38] sm:$0xff]  ;;  %v31_v29 = vld [vmem:[%s952_s1 + $0x50] sm:$0xff] }
   0xa   :  { %258 = vperm.xlu0 %651, %v26_v5   ;;  %652 = vset.pattern.permute.xlu1 %v677_v0  ;;  %v346_v30 = vld [vmem:[%s953_s2 + $0x48] sm:$0xff]  ;;  %v33_v33 = vld [vmem:[%s952_s1 + $0x60] sm:$0xff]  ;;  %v348_v43 = vld [vmem:[%s953_s2 + $0x58] sm:$0xff] }
   0xb   :  { %242 = vperm.xlu1 %652, %v22_v4   ;;  %v35_v47 = vld [vmem:[%s952_s1 + $0x70] sm:$0xff]  ;;  %v20_v52 = vld [vmem:[%s955_s0] sm:$0x7] }
   0xc   :  { %v866_v56 = vrot.slane %v20_v52, %v203_v51  ;;  %v868_v58 = vrot.slane %v20_v52, %v119_v53  ;;  %v872_v62 = vrot.slane %v20_v52, %v303_v57 }
   0xe   :  { %659 = vset.pattern.permute.xlu0 %v678_v1 }
   0xf   :  { %154 = vperm.xlu0 %659, %v25_v6   ;;  %653 = vset.pattern.permute.xlu1 %v679_v7 }
  0x10   :  { %49 = vperm.xlu1 %653, %v23_v3  }
  0x13   :  { %166 = vperm.xlu0 %659, %v28_v8  }
  0x14   :  { %654 = vset.pattern.permute.xlu1 %v678_v1 }
  0x15   :  { %146 = vperm.xlu1 %654, %v23_v3  }
  0x17   :  { %174 = vperm.xlu0 %659, %v737_v9  }
  0x19   :  { %150 = vperm.xlu1 %654, %v24_v10  }
  0x1b   :  { %182 = vperm.xlu0 %659, %v746_v11  }
  0x1d   :  { %655 = vset.pattern.permute.xlu1 %v677_v0 }
  0x1e   :  { %250 = vperm.xlu1 %655, %v24_v10  }
  0x1f   :  { %190 = vperm.xlu0 %659, %v752_v12  }
  0x22   :  { %656 = vset.pattern.permute.xlu1 %v679_v7 }
  0x23   :  { %198 = vperm.xlu0 %659, %v759_v13   ;;  %355 = vperm.xlu1 %656, %v337_v14  }
  0x27   :  { %674 = vset.pattern.permute.xlu0 %v679_v7  ;;  %59 = vperm.xlu1 %656, %v25_v6  }
  0x28   :  { %39 = vperm.xlu0 %674, %v21_v2  }
  0x2b   :  { %64 = vperm.xlu1 %656, %v26_v5  }
  0x2c   :  { %44 = vperm.xlu0 %674, %v22_v4  }
  0x2f   :  { %657 = vset.pattern.permute.xlu1 %v678_v1 }
  0x30   :  { %54 = vperm.xlu0 %674, %v24_v10   ;;  %158 = vperm.xlu1 %657, %v26_v5  }
  0x34   :  { %360 = vperm.xlu0 %674, %v338_v15   ;;  %658 = vset.pattern.permute.xlu1 %v677_v0 }
  0x35   :  { %254 = vperm.xlu1 %658, %v25_v6  }
  0x38   :  { %69 = vperm.xlu0 %674, %v27_v16  }
  0x39   :  { %660 = vset.pattern.permute.xlu1 %v679_v7 }
  0x3a   :  { %365 = vperm.xlu1 %660, %v339_v17  }
  0x3c   :  { %375 = vperm.xlu0 %674, %v341_v18  }
  0x3e   :  { %370 = vperm.xlu1 %660, %v340_v19  }
  0x40   :  { %84 = vperm.xlu0 %674, %v737_v9  }
  0x42   :  { %74 = vperm.xlu1 %660, %v28_v8  }
  0x44   :  { %385 = vperm.xlu0 %674, %v343_v20  }
  0x46   :  { %661 = vset.pattern.permute.xlu1 %v678_v1 }
  0x47   :  { %162 = vperm.xlu1 %661, %v27_v16  }
  0x48   :  { %94 = vperm.xlu0 %674, %v746_v11  }
  0x4b   :  { %662 = vset.pattern.permute.xlu1 %v677_v0 }
  0x4c   :  { %262 = vperm.xlu1 %662, %v27_v16   ;;  %395 = vperm.xlu0 %674, %v345_v21  }
  0x50   :  { %266 = vperm.xlu1 %662, %v28_v8   ;;  %104 = vperm.xlu0 %674, %v752_v12  }
  0x54   :  { %663 = vset.pattern.permute.xlu1 %v679_v7  ;;  %405 = vperm.xlu0 %674, %v347_v22  }
  0x55   :  { %380 = vperm.xlu1 %663, %v342_v23  }
  0x58   :  { %114 = vperm.xlu0 %674, %v759_v13  }
  0x59   :  { %79 = vperm.xlu1 %663, %v29_v24  }
  0x5c   :  { %415 = vperm.xlu0 %674, %v349_v25   ;;  %v542_v25 = vld [vmem:[%s954_s4] sm:$0xff] }
  0x5d   :  { %664 = vset.pattern.permute.xlu1 %v678_v1 }
  0x5e   :  { %170 = vperm.xlu1 %664, %v29_v24  }
  0x60   :  { %430 = vperm.xlu0 %674, %v352_v26  }
  0x62   :  { %665 = vset.pattern.permute.xlu1 %v677_v0 }
  0x63   :  { %270 = vperm.xlu1 %665, %v29_v24  }
  0x64   :  { %551 = vperm.xlu0 %674, %v543_v27  }
  0x67   :  { %274 = vperm.xlu1 %665, %v737_v9   ;;  %v350_v9 = vld [vmem:[%s953_s2 + $0x68] sm:$0xff] }
  0x6b   :  { %666 = vset.pattern.permute.xlu1 %v679_v7 }
  0x6c   :  { %390 = vperm.xlu1 %666, %v344_v28  }
  0x70   :  { %89 = vperm.xlu1 %666, %v31_v29  }
  0x74   :  { %667 = vset.pattern.permute.xlu1 %v678_v1 }
  0x75   :  { %178 = vperm.xlu1 %667, %v31_v29  }
  0x79   :  { %668 = vset.pattern.permute.xlu1 %v677_v0 }
  0x7a   :  { %278 = vperm.xlu1 %668, %v31_v29  }
  0x7e   :  { %282 = vperm.xlu1 %668, %v746_v11  }
  0x81   :  { %v139_v31 = vpop.permute.xlu1 %138  ;;  %v239_v32 = vpop.permute.xlu0 %238 }
  0x82   :  { %669 = vset.pattern.permute.xlu1 %v679_v7  ;;  %v205_v61 = vmul.f32 %v866_v56, %v139_v31 }
  0x83   :  { %400 = vperm.xlu1 %669, %v346_v30  }
  0x85   :  { %v143_v34 = vpop.permute.xlu1 %142  ;;  %v836_v35 = vpop.permute.xlu0 %246 }
  0x86   :  { %v206_v5 = vmul.f32 %v866_v56, %v143_v34  ;;  %v307_v22 = vmul.f32 %v872_v62, %v836_v35  ;;  %v465_v35 = vld [vmem:[%s956_s3] sm:$0xff] }
  0x87   :  { %99 = vperm.xlu1 %669, %v33_v33   ;;  %612 = vmatprep.mubr.f32.mxu0 %v465_v35 }
  0x89   :  { %v838_v36 = vpop.permute.xlu0 %258 }
  0x8a   :  { %v243_v37 = vpop.permute.xlu1 %242  ;;  %v310_v57 = vmul.f32 %v872_v62, %v838_v36 }
  0x8b   :  { %670 = vset.pattern.permute.xlu1 %v678_v1 }
  0x8c   :  { %186 = vperm.xlu1 %670, %v33_v33  }
  0x8e   :  { %v841_v38 = vpop.permute.xlu0 %154 }
  0x8f   :  { %v50_v39 = vpop.permute.xlu1 %49  ;;  %v209_v48 = vmul.f32 %v866_v56, %v841_v38 }
  0x90   :  { %671 = vset.pattern.permute.xlu1 %v677_v0  ;;  %v123_v18 = vmul.f32 %v868_v58, %v50_v39 }
  0x91   :  { %286 = vperm.xlu1 %671, %v33_v33  }
  0x92   :  { %v844_v40 = vpop.permute.xlu0 %166 }
  0x94   :  { %v147_v41 = vpop.permute.xlu1 %146 }
  0x95   :  { %290 = vperm.xlu1 %671, %v752_v12   ;;  %v306_v12 = vmul.f32 %v872_v62, %v243_v37  ;;  %v207_v14 = vmul.f32 %v866_v56, %v147_v41 }
  0x96   :  { %v847_v42 = vpop.permute.xlu0 %174 }
  0x98   :  { %v151_v45 = vpop.permute.xlu1 %150 }
  0x99   :  { %672 = vset.pattern.permute.xlu1 %v679_v7  ;;  %v208_v23 = vmul.f32 %v866_v56, %v151_v45 }
  0x9a   :  { %410 = vperm.xlu1 %672, %v348_v43   ;;  %v853_v46 = vpop.permute.xlu0 %182 }
  0x9d   :  { %v251_v49 = vpop.permute.xlu1 %250 }
  0x9e   :  { %109 = vperm.xlu1 %672, %v35_v47   ;;  %v858_v50 = vpop.permute.xlu0 %190  ;;  %v308_v30 = vmul.f32 %v872_v62, %v251_v49 }
  0xa2   :  { %673 = vset.pattern.permute.xlu1 %v678_v1  ;;  %v356_v54 = vpop.permute.xlu1 %355  ;;  %v864_v55 = vpop.permute.xlu0 %198  ;;  %v305_v1 = vmul.f32 %v872_v62, %v239_v32 }
  0xa3   :  { %194 = vperm.xlu1 %673, %v35_v47  }
  0xa6   :  { %v60_v59 = vpop.permute.xlu1 %59 }
  0xa7   :  { %v40_v60 = vpop.permute.xlu0 %39  ;;  %675 = vset.pattern.permute.xlu1 %v677_v0  ;;  %v125_v49 = vmul.f32 %v868_v58, %v60_v59 }
  0xa8   :  { %v121_v63 = vmul.f32 %v868_v58, %v40_v60  ;;  %294 = vperm.xlu1 %675, %v35_v47  }
  0xa9   :  { %v225_v60 = vadd.f32 %v209_v48, %v125_v49 }
  0xaa   :  { %v221_v2 = vadd.f32 %v205_v61, %v121_v63  ;;  %v65_v3 = vpop.permute.xlu1 %64 }
  0xab   :  { %v45_v4 = vpop.permute.xlu0 %44  ;;  %v126_v53 = vmul.f32 %v868_v58, %v65_v3 }
  0xac   :  { %v122_v6 = vmul.f32 %v868_v58, %v45_v4  ;;  %298 = vperm.xlu1 %675, %v759_v13   ;;  %v321_v8 = vadd.f32 %v305_v1, %v221_v2  ;;  %v351_v13 = vld [vmem:[%s953_s2 + $0x70] sm:$0xff] }
  0xae   :  { %v222_v0 = vadd.f32 %v206_v5, %v122_v6  ;;  %v433_v16 = vadd.f32 %v356_v54, %v321_v8 }
  0xaf   :  { %v55_v10 = vpop.permute.xlu0 %54  ;;  %v159_v11 = vpop.permute.xlu1 %158 }
  0xb0   :  { %676 = vset.pattern.permute.xlu1 %v679_v7  ;;  %v322_v15 = vadd.f32 %v306_v12, %v222_v0  ;;  %v124_v19 = vmul.f32 %v868_v58, %v55_v10  ;;  %v223_v7 = vadd.f32 %v207_v14, %v123_v18  ;;  %v449_v26 = vmax.f32 %v433_v16, 0.0 }
  0xb1   :  { %420 = vperm.xlu1 %676, %v350_v9   ;;  %v210_v51 = vmul.f32 %v866_v56, %v159_v11 }
  0xb2   :  { %v224_v27 = vadd.f32 %v208_v23, %v124_v19  ;;  %v323_v31 = vadd.f32 %v307_v22, %v223_v7 }
  0xb3   :  { %v361_v17 = vpop.permute.xlu0 %360  ;;  %v226_v61 = vadd.f32 %v210_v51, %v126_v53 }
  0xb4   :  { %v434_v20 = vadd.f32 %v361_v17, %v322_v15  ;;  %v255_v21 = vpop.permute.xlu1 %254  ;;  %v324_v33 = vadd.f32 %v308_v30, %v224_v27  ;;  %v212_v15 = vmul.f32 %v866_v56, %v844_v40  ;;  %v214_v30 = vmul.f32 %v866_v56, %v847_v42 }
  0xb5   :  { %425 = vperm.xlu1 %676, %v351_v13   ;;  %v309_v54 = vmul.f32 %v872_v62, %v255_v21  ;;  %v326_v5 = vadd.f32 %v310_v57, %v226_v61 }
  0xb6   :  { %v450_v24 = vmax.f32 %v434_v20, 0.0 }
  0xb7   :  { %v70_v47 = vpop.permute.xlu0 %69  ;;  %v325_v2 = vadd.f32 %v309_v54, %v225_v60 }
  0xb8   :  { %v615_v28 = vpack.c.bf16 %v450_v24, %v449_v26  ;;  %v127_v10 = vmul.f32 %v868_v58, %v70_v47 }
  0xb9   :  { %546 = vperm.xlu1 %676, %v542_v25   ;;  %v366_v29 = vpop.permute.xlu1 %365 }
  0xba   :  { %616 = vmatprep.subr.bf16.mxu0 %v615_v28  ;;  %v435_v32 = vadd.f32 %v366_v29, %v323_v31 }
  0xbb   :  { %618 = vmatpush3.bf16.msra.mxu0 %v615_v28  ;;  %v376_v1 = vpop.permute.xlu0 %375 }
  0xbc   :  { %v451_v39 = vmax.f32 %v435_v32, 0.0  ;;  %v437_v4 = vadd.f32 %v376_v1, %v325_v2 }
  0xbd   :  { %v371_v34 = vpop.permute.xlu1 %370 }
  0xbe   :  { %v436_v37 = vadd.f32 %v371_v34, %v324_v33  ;;  %v453_v59 = vmax.f32 %v437_v4, 0.0  ;;  %v216_v4 = vmul.f32 %v866_v56, %v853_v46 }
  0xbf   :  { %v85_v11 = vpop.permute.xlu0 %84 }
  0xc0   :  { %v452_v41 = vmax.f32 %v436_v37, 0.0  ;;  %v130_v31 = vmul.f32 %v868_v58, %v85_v11 }
  0xc1   :  { %v75_v43 = vpop.permute.xlu1 %74 }
  0xc2   :  { %v619_v44 = vpack.c.bf16 %v452_v41, %v451_v39  ;;  %v128_v13 = vmul.f32 %v868_v58, %v75_v43  ;;  %v230_v39 = vadd.f32 %v214_v30, %v130_v31 }
  0xc3   :  { %v386_v20 = vpop.permute.xlu0 %385 }
  0xc4   :  { %620 = vmatprep.subr.bf16.mxu0 %v619_v44  ;;  %v228_v21 = vadd.f32 %v212_v15, %v128_v13 }
  0xc5   :  { %622 = vmatpush3.bf16.msra.mxu0 %v619_v44 }
  0xc6   :  { %v163_v45 = vpop.permute.xlu1 %162 }
  0xc7   :  { %v211_v36 = vmul.f32 %v866_v56, %v163_v45  ;;  %v95_v35 = vpop.permute.xlu0 %94 }
  0xc9   :  { %v227_v16 = vadd.f32 %v211_v36, %v127_v10 }
  0xcb   :  { %v263_v52 = vpop.permute.xlu1 %262  ;;  %v396_v45 = vpop.permute.xlu0 %395 }
  0xcc   :  { %v311_v12 = vmul.f32 %v872_v62, %v263_v52 }
  0xce   :  { %v327_v17 = vadd.f32 %v311_v12, %v227_v16 }
  0xcf   :  { %v267_v63 = vpop.permute.xlu1 %266  ;;  %v105_v2 = vpop.permute.xlu0 %104 }
  0xd0   :  { %v312_v18 = vmul.f32 %v872_v62, %v267_v63  ;;  %v439_v22 = vadd.f32 %v386_v20, %v327_v17 }
  0xd2   :  { %v328_v7 = vadd.f32 %v312_v18, %v228_v21  ;;  %v455_v25 = vmax.f32 %v439_v22, 0.0  ;;  %v218_v22 = vmul.f32 %v866_v56, %v858_v50 }
  0xd4   :  { %v381_v38 = vpop.permute.xlu1 %380 }
  0xd5   :  { %v438_v6 = vadd.f32 %v381_v38, %v326_v5  ;;  %v132_v5 = vmul.f32 %v868_v58, %v95_v35 }
  0xd7   :  { %v454_v8 = vmax.f32 %v438_v6, 0.0 }
  0xd8   :  { %v80_v0 = vpop.permute.xlu1 %79 }
  0xd9   :  { %v623_v9 = vpack.c.bf16 %v454_v8, %v453_v59  ;;  %v129_v32 = vmul.f32 %v868_v58, %v80_v0  ;;  %v232_v0 = vadd.f32 %v216_v4, %v132_v5 }
  0xdb   :  { %624 = vmatprep.subr.bf16.mxu0 %v623_v9 }
  0xdc   :  { %626 = vmatpush3.bf16.msra.mxu0 %v623_v9  ;;  %v406_v9 = vpop.permute.xlu0 %405 }
  0xdd   :  { %v171_v3 = vpop.permute.xlu1 %170 }
  0xde   :  { %v213_v29 = vmul.f32 %v866_v56, %v171_v3 }
  0xe0   :  { %v229_v37 = vadd.f32 %v213_v29, %v129_v32  ;;  %v115_v17 = vpop.permute.xlu0 %114 }
  0xe2   :  { %v271_v14 = vpop.permute.xlu1 %270 }
  0xe3   :  { %v313_v33 = vmul.f32 %v872_v62, %v271_v14 }
  0xe5   :  { %v329_v41 = vadd.f32 %v313_v33, %v229_v37 }
  0xe6   :  { %v275_v19 = vpop.permute.xlu1 %274 }
  0xe7   :  { %v314_v43 = vmul.f32 %v872_v62, %v275_v19  ;;  %v441_v47 = vadd.f32 %v396_v45, %v329_v41 }
  0xe9   :  { %v330_v48 = vadd.f32 %v314_v43, %v230_v39  ;;  %v457_v42 = vmax.f32 %v441_v47, 0.0 }
  0xeb   :  { %v391_v23 = vpop.permute.xlu1 %390 }
  0xec   :  { %v440_v24 = vadd.f32 %v391_v23, %v328_v7  ;;  %v220_v7 = vmul.f32 %v866_v56, %v864_v55  ;;  %v134_v23 = vmul.f32 %v868_v58, %v105_v2 }
  0xee   :  { %v456_v26 = vmax.f32 %v440_v24, 0.0  ;;  %v136_v24 = vmul.f32 %v868_v58, %v115_v17  ;;  %v234_v29 = vadd.f32 %v218_v22, %v134_v23 }
  0xef   :  { %v90_v27 = vpop.permute.xlu1 %89 }
  0xf0   :  { %v627_v28 = vpack.c.bf16 %v456_v26, %v455_v25  ;;  %v131_v61 = vmul.f32 %v868_v58, %v90_v27  ;;  %v236_v30 = vadd.f32 %v220_v7, %v136_v24 }
  0xf2   :  { %628 = vmatprep.subr.bf16.mxu0 %v627_v28 }
  0xf3   :  { %630 = vmatpush3.bf16.msra.mxu0 %v627_v28  ;;  %v416_v28 = vpop.permute.xlu0 %415 }
  0xf4   :  { %v179_v40 = vpop.permute.xlu1 %178 }
  0xf5   :  { %v215_v60 = vmul.f32 %v866_v56, %v179_v40 }
  0xf7   :  { %v231_v38 = vadd.f32 %v215_v60, %v131_v61  ;;  %v431_v41 = vpop.permute.xlu0 %430 }
  0xf9   :  { %v279_v34 = vpop.permute.xlu1 %278 }
  0xfa   :  { %v315_v63 = vmul.f32 %v872_v62, %v279_v34 }
  0xfc   :  { %v331_v6 = vadd.f32 %v315_v63, %v231_v38 }
  0xfd   :  { %v283_v44 = vpop.permute.xlu1 %282 }
  0xfe   :  { %v316_v59 = vmul.f32 %v872_v62, %v283_v44  ;;  %v443_v3 = vadd.f32 %v406_v9, %v331_v6 }
 0x100   :  { %v332_v10 = vadd.f32 %v316_v59, %v232_v0  ;;  %v459_v12 = vmax.f32 %v443_v3, 0.0 }
 0x102   :  { %v401_v49 = vpop.permute.xlu1 %400 }
 0x103   :  { %v442_v51 = vadd.f32 %v401_v49, %v330_v48 }
 0x105   :  { %v458_v52 = vmax.f32 %v442_v51, 0.0 }
 0x106   :  { %v100_v53 = vpop.permute.xlu1 %99 }
 0x107   :  { %v631_v54 = vpack.c.bf16 %v458_v52, %v457_v42  ;;  %v133_v18 = vmul.f32 %v868_v58, %v100_v53  ;;  %v552_v52 = vpop.permute.xlu0 %551 }
 0x109   :  { %632 = vmatprep.subr.bf16.mxu0 %v631_v54 }
 0x10a   :  { %634 = vmatpush3.bf16.msra.mxu0 %v631_v54 }
 0x10b   :  { %v187_v57 = vpop.permute.xlu1 %186 }
 0x10c   :  { %v217_v16 = vmul.f32 %v866_v56, %v187_v57 }
 0x10e   :  { %v233_v21 = vadd.f32 %v217_v16, %v133_v18 }
 0x110   :  { %v287_v1 = vpop.permute.xlu1 %286 }
 0x111   :  { %v317_v19 = vmul.f32 %v872_v62, %v287_v1 }
 0x113   :  { %v333_v25 = vadd.f32 %v317_v19, %v233_v21 }
 0x114   :  { %v291_v8 = vpop.permute.xlu1 %290 }
 0x115   :  { %v318_v26 = vmul.f32 %v872_v62, %v291_v8  ;;  %v445_v32 = vadd.f32 %v416_v28, %v333_v25 }
 0x117   :  { %v334_v34 = vadd.f32 %v318_v26, %v234_v29  ;;  %v461_v44 = vmax.f32 %v445_v32, 0.0 }
 0x119   :  { %v411_v36 = vpop.permute.xlu1 %410 }
 0x11a   :  { %v444_v11 = vadd.f32 %v411_v36, %v332_v10 }
 0x11c   :  { %v460_v14 = vmax.f32 %v444_v11, 0.0 }
 0x11d   :  { %v110_v15 = vpop.permute.xlu1 %109 }
 0x11e   :  { %v635_v13 = vpack.c.bf16 %v460_v14, %v459_v12  ;;  %v135_v50 = vmul.f32 %v868_v58, %v110_v15 }
 0x120   :  { %636 = vmatprep.subr.bf16.mxu0 %v635_v13 }
 0x121   :  { %638 = vmatpush3.bf16.msra.mxu0 %v635_v13 }
 0x122   :  { %v195_v46 = vpop.permute.xlu1 %194 }
 0x123   :  { %v219_v31 = vmul.f32 %v866_v56, %v195_v46 }
 0x125   :  { %v235_v37 = vadd.f32 %v219_v31, %v135_v50 }
 0x127   :  { %v295_v20 = vpop.permute.xlu1 %294 }
 0x128   :  { %v319_v55 = vmul.f32 %v872_v62, %v295_v20 }
 0x12a   :  { %v335_v47 = vadd.f32 %v319_v55, %v235_v37 }
 0x12b   :  { %v299_v27 = vpop.permute.xlu1 %298 }
 0x12c   :  { %v320_v40 = vmul.f32 %v872_v62, %v299_v27  ;;  %v466_v62 = vld [vmem:[%s956_s3 + $0x8] sm:$0xff] }
 0x12e   :  { %v336_v33 = vadd.f32 %v320_v40, %v236_v30 }
 0x130   :  { %v421_v35 = vpop.permute.xlu1 %420  ;;  %v448_v43 = vadd.f32 %v431_v41, %v336_v33 }
 0x131   :  { %v446_v39 = vadd.f32 %v421_v35, %v334_v34 }
 0x132   :  { %v464_v56 = vmax.f32 %v448_v43, 0.0 }
 0x133   :  { %v462_v45 = vmax.f32 %v446_v39, 0.0 }
 0x134   :  { %v426_v48 = vpop.permute.xlu1 %425 }
 0x135   :  { %v639_v49 = vpack.c.bf16 %v462_v45, %v461_v44  ;;  %v447_v51 = vadd.f32 %v426_v48, %v335_v47 }
 0x137   :  { %v463_v42 = vmax.f32 %v447_v51, 0.0  ;;  %640 = vmatprep.subr.bf16.mxu0 %v639_v49 }
 0x138   :  { %642 = vmatpush3.bf16.msra.mxu0 %v639_v49  ;;  %v547_v54 = vpop.permute.xlu1 %546 }
 0x139   :  { %v643_v58 = vpack.c.bf16 %v464_v56, %v463_v42 }
 0x13b   :  { %644 = vmatprep.subr.bf16.mxu0 %v643_v58 }
 0x13c   :  { %646 = vmatpush3.bf16.msra.mxu0 %v643_v58 }
 0x13f   :  { %613 = vmatmul.mubr.f32.vlgmr.msra.gmra.mrb[0].mxu0 %v466_v62 }
 0x212   :  { %v614_v53 = vpop.f32.mrb[0].mxu0 }
 0x213   :  { %v555_v57 = vadd.f32 %v614_v53, %v552_v52  ;;  %v533_v60 = vpop.f32.mrb[1].mxu0 }
 0x214   :  { %v554_v61 = vadd.f32 %v547_v54, %v533_v60 }
 0x215   :  { %557 = vst [vmem:[%s957_s5 + $0x8] sm:$0x7] %v555_v57 }
 0x216   :  { %556 = vst [vmem:[%s957_s5] sm:$0xff] %v554_v61 }

</bundles_post_ra>
